<compile_context>
chip_gen: v7x
topology: tpu7x:2x2x1
jax: 0.10.0
libtpu: 0.0.40
codegen_flags: <defaults>
</compile_context>

<pallas_src>
import numpy as np
import jax
import jax.numpy as jnp
from jax.experimental import pallas as pl
from jax.experimental.pallas import tpu as pltpu


def _round_up(x, m):
    return ((x + m - 1) // m) * m


def _cdiv(a, b):
    return -(-a // b)


def _vmem_plan():
    """(data_budget_bytes, vmem_limit_bytes) derived from this chip's VMEM capacity."""
    try:
        cap = int(pltpu.get_tpu_info().vmem_capacity_bytes)
    except Exception:
        cap = 64 * 1024 * 1024      # conservative fallback (v7x per-TC size)
    cap = max(cap, 32 * 1024 * 1024)
    data_budget = int(0.40 * cap)   # double-buffered streams + per-segment f32 working set
    vmem_limit = int(0.75 * cap)    # explicit scoped-VMEM limit, headroom for compiler scratch
    return data_budget, vmem_limit


def _plan_tiles(B, D, L, in_itemsize, lab_itemsize, feature_dims,
                data_budget, nc, max_tile_b):
    """Largest multiple-of-8 batch tile whose streamed + on-chip working set fits."""
    fd_max = max(int(f) for f in feature_dims)
    per_row = (4 * D * in_itemsize        # rep_a + rep_b, double-buffered
               + 4 * L * lab_itemsize     # labels, double-buffered
               + 6 * fd_max * 4           # per-segment f32 slices + products (live set)
               + 64)                      # row mask / (tb,1) temporaries
    tb = max(8, (data_budget // per_row) // 8 * 8)
    tb = min(tb, _round_up(B, 8))
    if max_tile_b is not None:
        tb = min(tb, max(8, _round_up(int(max_tile_b), 8)))
    nt = _cdiv(B, tb)
    if nt >= nc:
        # Re-balance so the tile count is a multiple of the core-split factor
        # (no phantom tiles -> no redundant DMA on the last core).
        nt = _round_up(nt, nc)
        tb = min(tb, _round_up(_cdiv(B, nt), 8))
    else:
        nt = nc   # tiny batch: phantom tiles exist but are clamped + fully masked
    return tb, nt, nt // nc


def _make_distil_kernel(feature_dims, B, tb, npc):
    feature_dims = tuple(int(f) for f in feature_dims)

    def kernel(a_ref, b_ref, labels_ref, bias_ref, acc_ref):
        c = pl.program_id(0)              # "parallel" core-split axis
        i = pl.program_id(1)              # "arbitrary" accumulation axis

        @pl.when(i == 0)
        def _init():
            acc_ref[...] = jnp.zeros_like(acc_ref)

        # Global (unclamped) tile index -> row-validity mask.  Handles both the
        # ragged batch tail (B % tb != 0) and phantom tiles (whose clamped DMA
        # re-reads the last real tile: the mask zeroes their contribution).
        t = c * npc + i
        row_ids = t * tb + jax.lax.broadcasted_iota(jnp.int32, (tb, 1), 0)
        row_valid = row_ids < B

        labels = labels_ref[...].astype(jnp.float32)          # (tb, L)

        eps = jnp.float32(1e-8)
        sq_sum = jnp.zeros((tb, 1), jnp.float32)
        start = 0
        for l, fd in enumerate(feature_dims):
            stop = start + fd
            # Per-segment ref slices: live f32 working set is O(tb * fd_max),
            # never O(tb * D); unused trailing columns (sum(fd) < D) are skipped.
            a_s = a_ref[:, start:stop].astype(jnp.float32)     # (tb, fd)
            b_s = b_ref[:, start:stop].astype(jnp.float32)
            s_ab = jnp.sum(a_s * b_s, axis=-1, keepdims=True)  # (tb, 1)
            s_aa = jnp.sum(a_s * a_s, axis=-1, keepdims=True)
            s_bb = jnp.sum(b_s * b_s, axis=-1, keepdims=True)
            # Per-norm 1e-8 clamp + exact divide, matching torch cosine_similarity.
            denom = (jnp.maximum(jnp.sqrt(s_aa), eps) *
                     jnp.maximum(jnp.sqrt(s_bb), eps))
            cos = s_ab / denom
            d = bias_ref[l] * cos - labels[:, l:l + 1]         # score_bias[l] from SMEM
            sq_sum = sq_sum + d * d
            start = stop

        # This tile's SSE; invalid rows are *selected* out, so garbage never leaks.
        sse = jnp.sum(jnp.where(row_valid, sq_sum, jnp.float32(0.0)))

        # Deposit into element [0,0] of this core's (8,128) accumulator block.
        r_io = jax.lax.broadcasted_iota(jnp.int32, (8, 128), 0)
        c_io = jax.lax.broadcasted_iota(jnp.int32, (8, 128), 1)
        acc_ref[...] += jnp.where((r_io == 0) & (c_io == 0), sse, jnp.float32(0.0))

    return kernel


def distil_loss(rep_a, rep_b, labels, feature_dims, score_bias,
                num_core_splits=2, max_tile_b=None):
    """DistilLoss forward: MSE( score_bias * per-segment cosine(rep_a, rep_b), labels )."""
    B, D = rep_a.shape
    L = len(feature_dims)
    assert rep_b.shape == (B, D)
    assert labels.shape == (B, L)
    assert sum(feature_dims) <= D

    in_itemsize = jnp.dtype(rep_a.dtype).itemsize
    lab_itemsize = jnp.dtype(labels.dtype).itemsize
    nc = max(1, int(num_core_splits))
    data_budget, vmem_limit = _vmem_plan()
    tb, nt, npc = _plan_tiles(B, D, L, in_itemsize, lab_itemsize, feature_dims,
                              data_budget, nc, max_tile_b)

    last_block = _cdiv(B, tb) - 1

    def row_map(c, i):
        # Clamp phantom / past-the-end tile indices so every DMA stays in-bounds;
        # the kernel's row mask (built from the *unclamped* index) zeroes them.
        return (jnp.minimum(c * npc + i, last_block), 0)

    bias = jnp.asarray(score_bias, dtype=jnp.float32).reshape(L)
    kernel = _make_distil_kernel(feature_dims, B, tb, npc)

    d_used = int(sum(int(f) for f in feature_dims))
    cost = pl.CostEstimate(
        flops=int(6 * B * d_used + 12 * B * L),
        transcendentals=int(2 * B * L),
        bytes_accessed=int(2 * B * D * in_itemsize + B * L * lab_itemsize
                           + nc * 8 * 128 * 4),
    )

    partials = pl.pallas_call(
        kernel,
        out_shape=jax.ShapeDtypeStruct((nc * 8, 128), jnp.float32),
        grid=(nc, npc),
        in_specs=[
            pl.BlockSpec((tb, D), row_map),                       # rep_a (caller dtype)
            pl.BlockSpec((tb, D), row_map),                       # rep_b (caller dtype)
            pl.BlockSpec((tb, L), row_map),                       # labels (caller dtype)
            pl.BlockSpec(memory_space=pltpu.MemorySpace.SMEM),    # score_bias scalars
        ],
        out_specs=pl.BlockSpec((8, 128), lambda c, i: (c, 0)),    # per-core partial SSE
        compiler_params=pltpu.CompilerParams(
            dimension_semantics=("parallel", "arbitrary"),
            vmem_limit_bytes=vmem_limit),
        cost_estimate=cost,
    )(rep_a, rep_b, labels, bias)

    # nn.MSELoss(mean): tiny cross-core reduction + 1/(B*L) scale outside the kernel.
    return jnp.sum(partials) * jnp.float32(1.0 / (B * L))


def distil_loss_ref(rep_a, rep_b, labels, feature_dims, score_bias):
    """Pure-JAX reference mirroring the PyTorch forward."""
    sims = []
    start = 0
    for fd in feature_dims:
        ax = rep_a[:, start:start + fd]
        bx = rep_b[:, start:start + fd]
        na = jnp.maximum(jnp.linalg.norm(ax, axis=-1), 1e-8)
        nb = jnp.maximum(jnp.linalg.norm(bx, axis=-1), 1e-8)
        sims.append(jnp.sum(ax * bx, axis=-1) / (na * nb))
        start += fd
    outputs = jnp.stack(sims).T * jnp.asarray(score_bias, jnp.float32)
    return jnp.mean((outputs - labels) ** 2)


if __name__ == "__main__":
    key = jax.random.PRNGKey(0)
    k1, k2, k3, k4, k5, k6, k7, k8 = jax.random.split(key, 8)

    feature_dims = [16, 16, 32]                       # num_labels = 3
    L = len(feature_dims)
    D = sum(feature_dims)                             # sentence_embedding_dimension = 64
    score_bias = np.ones((L,), dtype=np.float32)      # default bias init (torch.ones)

    # Case 1: bf16 embeddings (kernel streams bf16, upcasts on-chip), single real tile.
    B1 = 8
    a1 = jax.random.normal(k1, (B1, D), dtype=jnp.float32).astype(jnp.bfloat16)
    b1 = jax.random.normal(k2, (B1, D), dtype=jnp.float32).astype(jnp.bfloat16)
    y1 = jax.random.uniform(k3, (B1, L), dtype=jnp.float32)
    loss1 = distil_loss(a1, b1, y1, feature_dims, score_bias)
    jax.block_until_ready(loss1)
    ref1 = distil_loss_ref(a1.astype(jnp.float32), b1.astype(jnp.float32), y1,
                           feature_dims, score_bias)
    np.testing.assert_allclose(np.asarray(loss1), np.asarray(ref1), rtol=1e-5, atol=1e-6)

    # Case 2: f32, forced small tile -> 2 tiles per core-split, exercises the
    # per-core accumulator across the inner "arbitrary" axis.
    B2 = 32
    a2 = jax.random.normal(k4, (B2, D), dtype=jnp.float32)
    b2 = jax.random.normal(k5, (B2, D), dtype=jnp.float32)
    y2 = jax.random.uniform(k6, (B2, L), dtype=jnp.float32)
    bias2 = np.array([1.0, 0.5, 2.0], dtype=np.float32)
    loss2 = distil_loss(a2, b2, y2, feature_dims, bias2, max_tile_b=8)
    jax.block_until_ready(loss2)
    ref2 = distil_loss_ref(a2, b2, y2, feature_dims, bias2)
    np.testing.assert_allclose(np.asarray(loss2), np.asarray(ref2), rtol=1e-5, atol=1e-6)

    # Case 3: batch smaller than one tile (B=5): ragged-tail masking, phantom tile
    # on the second core-split (clamped DMA, fully masked).
    B3 = 5
    a3 = jax.random.normal(k1, (B3, D), dtype=jnp.float32)
    b3 = jax.random.normal(k2, (B3, D), dtype=jnp.float32)
    y3 = jax.random.uniform(k3, (B3, L), dtype=jnp.float32)
    loss3 = distil_loss(a3, b3, y3, feature_dims, score_bias)
    jax.block_until_ready(loss3)
    ref3 = distil_loss_ref(a3, b3, y3, feature_dims, score_bias)
    np.testing.assert_allclose(np.asarray(loss3), np.asarray(ref3), rtol=1e-5, atol=1e-6)

    # Case 4: multi-tile ragged batch (B=20, tile 8): partial last real tile plus a
    # clamped phantom tile — exercises both the clamp and the in-kernel row mask.
    B4 = 20
    a4 = jax.random.normal(k7, (B4, D), dtype=jnp.float32).astype(jnp.bfloat16)
    b4 = jax.random.normal(k8, (B4, D), dtype=jnp.float32).astype(jnp.bfloat16)
    y4 = jax.random.uniform(k4, (B4, L), dtype=jnp.float32)
    loss4 = distil_loss(a4, b4, y4, feature_dims, score_bias, max_tile_b=8)
    jax.block_until_ready(loss4)
    ref4 = distil_loss_ref(a4.astype(jnp.float32), b4.astype(jnp.float32), y4,
                           feature_dims, score_bias)
    np.testing.assert_allclose(np.asarray(loss4), np.asarray(ref4), rtol=1e-5, atol=1e-6)

    print("KERNEL_OK")
</pallas_src>

<mosaic_0001>
module attributes {stable_mosaic.version = 11 : i64} {
  func.func @kernel(%arg0: i32, %arg1: i32, %arg2: memref<8x64xbf16, #tpu.memory_space<vmem>>, %arg3: memref<8x64xbf16, #tpu.memory_space<vmem>>, %arg4: memref<8x3xf32, #tpu.memory_space<vmem>>, %arg5: memref<3xf32, #tpu.memory_space<smem>>, %arg6: memref<8x128xf32, #tpu.memory_space<vmem>>) attributes {dimension_semantics = [#tpu.dimension_semantics<parallel>, #tpu.dimension_semantics<arbitrary>], iteration_bounds = array<i64: 2, 1>, scalar_prefetch = 0 : i64, scratch_operands = 0 : i64, tpu.core_type = #tpu.core_type<tc>, window_params = [{transform_indices = @transform_0, window_bounds = array<i64: 8, 64>}, {transform_indices = @transform_1, window_bounds = array<i64: 8, 64>}, {transform_indices = @transform_2, window_bounds = array<i64: 8, 3>}, {transform_indices = @transform_3, window_bounds = array<i64: 3>}, {transform_indices = @transform_4, window_bounds = array<i64: 8, 128>}]} {
    %c0_i32 = arith.constant 0 : i32
    %0 = arith.cmpi eq, %arg1, %c0_i32 : i32
    %1 = arith.extui %0 : i1 to i32
    %c0_i32_0 = arith.constant 0 : i32
    %2 = arith.cmpi ne, %1, %c0_i32_0 : i32
    scf.if %2 {
      %cst_38 = arith.constant 0.000000e+00 : f32
      %116 = vector.broadcast %cst_38 : f32 to vector<8x128xf32>
      %c0_39 = arith.constant 0 : index
      %c0_40 = arith.constant 0 : index
      %117 = vector.load %arg6[%c0_39, %c0_40] : memref<8x128xf32, #tpu.memory_space<vmem>>, vector<8x128xf32>
      tpu.vector_store %arg6[%c0_39, %c0_40], %116 {strides = array<i32>} : memref<8x128xf32, #tpu.memory_space<vmem>>, vector<8x128xf32>,
    } else {
    }
    %c1_i32 = arith.constant 1 : i32
    %3 = arith.muli %arg0, %c1_i32 : i32
    %4 = arith.addi %3, %arg1 : i32
    %c8_i32 = arith.constant 8 : i32
    %5 = arith.muli %4, %c8_i32 : i32
    %6 = tpu.iota {dimensions = array<i32: 0>} : vector<8x1xi32>
    %7 = vector.broadcast %5 : i32 to vector<8x1xi32>
    %8 = arith.addi %7, %6 : vector<8x1xi32>
    %c8_i32_1 = arith.constant 8 : i32
    %9 = vector.broadcast %c8_i32_1 : i32 to vector<8x1xi32>
    %10 = arith.cmpi slt, %8, %9 : vector<8x1xi32>
    %c0 = arith.constant 0 : index
    %c0_2 = arith.constant 0 : index
    %11 = vector.load %arg4[%c0, %c0_2] : memref<8x3xf32, #tpu.memory_space<vmem>>, vector<8x3xf32>
    %cst = arith.constant 0.000000e+00 : f32
    %12 = vector.broadcast %cst : f32 to vector<8x1xf32>
    %c0_3 = arith.constant 0 : index
    %c0_4 = arith.constant 0 : index
    %13 = vector.load %arg2[%c0_3, %c0_4] : memref<8x64xbf16, #tpu.memory_space<vmem>>, vector<8x16xbf16>
    %14 = arith.extf %13 : vector<8x16xbf16> to vector<8x16xf32>
    %c0_5 = arith.constant 0 : index
    %c0_6 = arith.constant 0 : index
    %15 = vector.load %arg3[%c0_5, %c0_6] : memref<8x64xbf16, #tpu.memory_space<vmem>>, vector<8x16xbf16>
    %16 = arith.extf %15 : vector<8x16xbf16> to vector<8x16xf32>
    %17 = arith.mulf %14, %16 : vector<8x16xf32>
    %cst_7 = arith.constant dense<0.000000e+00> : vector<8xf32>
    %18 = vector.multi_reduction <add>, %17, %cst_7 [1] : vector<8x16xf32> to vector<8xf32>
    %19 = vector.shape_cast %18 : vector<8xf32> to vector<8x1xf32>
    %20 = arith.mulf %14, %14 : vector<8x16xf32>
    %cst_8 = arith.constant dense<0.000000e+00> : vector<8xf32>
    %21 = vector.multi_reduction <add>, %20, %cst_8 [1] : vector<8x16xf32> to vector<8xf32>
    %22 = vector.shape_cast %21 : vector<8xf32> to vector<8x1xf32>
    %23 = arith.mulf %16, %16 : vector<8x16xf32>
    %cst_9 = arith.constant dense<0.000000e+00> : vector<8xf32>
    %24 = vector.multi_reduction <add>, %23, %cst_9 [1] : vector<8x16xf32> to vector<8xf32>
    %25 = vector.shape_cast %24 : vector<8xf32> to vector<8x1xf32>
    %26 = math.sqrt %22 : vector<8x1xf32>
    %cst_10 = arith.constant 9.99999993E-9 : f32
    %27 = vector.broadcast %cst_10 : f32 to vector<8x1xf32>
    %28 = arith.maximumf %26, %27 : vector<8x1xf32>
    %29 = math.sqrt %25 : vector<8x1xf32>
    %cst_11 = arith.constant 9.99999993E-9 : f32
    %30 = vector.broadcast %cst_11 : f32 to vector<8x1xf32>
    %31 = arith.maximumf %29, %30 : vector<8x1xf32>
    %32 = arith.mulf %28, %31 : vector<8x1xf32>
    %33 = arith.divf %19, %32 : vector<8x1xf32>
    %c0_12 = arith.constant 0 : index
    %34 = memref.load %arg5[%c0_12] : memref<3xf32, #tpu.memory_space<smem>>
    %35 = vector.broadcast %34 : f32 to vector<8x1xf32>
    %36 = arith.mulf %35, %33 : vector<8x1xf32>
    %37 = vector.extract_strided_slice %11 {offsets = [0, 0], sizes = [8, 1], strides = [1, 1]} : vector<8x3xf32> to vector<8x1xf32>
    %38 = arith.subf %36, %37 : vector<8x1xf32>
    %39 = arith.mulf %38, %38 : vector<8x1xf32>
    %40 = arith.addf %12, %39 : vector<8x1xf32>
    %c0_13 = arith.constant 0 : index
    %c16 = arith.constant 16 : index
    %41 = vector.load %arg2[%c0_13, %c16] : memref<8x64xbf16, #tpu.memory_space<vmem>>, vector<8x16xbf16>
    %42 = arith.extf %41 : vector<8x16xbf16> to vector<8x16xf32>
    %c0_14 = arith.constant 0 : index
    %c16_15 = arith.constant 16 : index
    %43 = vector.load %arg3[%c0_14, %c16_15] : memref<8x64xbf16, #tpu.memory_space<vmem>>, vector<8x16xbf16>
    %44 = arith.extf %43 : vector<8x16xbf16> to vector<8x16xf32>
    %45 = arith.mulf %42, %44 : vector<8x16xf32>
    %cst_16 = arith.constant dense<0.000000e+00> : vector<8xf32>
    %46 = vector.multi_reduction <add>, %45, %cst_16 [1] : vector<8x16xf32> to vector<8xf32>
    %47 = vector.shape_cast %46 : vector<8xf32> to vector<8x1xf32>
    %48 = arith.mulf %42, %42 : vector<8x16xf32>
    %cst_17 = arith.constant dense<0.000000e+00> : vector<8xf32>
    %49 = vector.multi_reduction <add>, %48, %cst_17 [1] : vector<8x16xf32> to vector<8xf32>
    %50 = vector.shape_cast %49 : vector<8xf32> to vector<8x1xf32>
    %51 = arith.mulf %44, %44 : vector<8x16xf32>
    %cst_18 = arith.constant dense<0.000000e+00> : vector<8xf32>
    %52 = vector.multi_reduction <add>, %51, %cst_18 [1] : vector<8x16xf32> to vector<8xf32>
    %53 = vector.shape_cast %52 : vector<8xf32> to vector<8x1xf32>
    %54 = math.sqrt %50 : vector<8x1xf32>
    %cst_19 = arith.constant 9.99999993E-9 : f32
    %55 = vector.broadcast %cst_19 : f32 to vector<8x1xf32>
    %56 = arith.maximumf %54, %55 : vector<8x1xf32>
    %57 = math.sqrt %53 : vector<8x1xf32>
    %cst_20 = arith.constant 9.99999993E-9 : f32
    %58 = vector.broadcast %cst_20 : f32 to vector<8x1xf32>
    %59 = arith.maximumf %57, %58 : vector<8x1xf32>
    %60 = arith.mulf %56, %59 : vector<8x1xf32>
    %61 = arith.divf %47, %60 : vector<8x1xf32>
    %c1 = arith.constant 1 : index
    %62 = memref.load %arg5[%c1] : memref<3xf32, #tpu.memory_space<smem>>
    %63 = vector.broadcast %62 : f32 to vector<8x1xf32>
    %64 = arith.mulf %63, %61 : vector<8x1xf32>
    %65 = vector.extract_strided_slice %11 {offsets = [0, 1], sizes = [8, 1], strides = [1, 1]} : vector<8x3xf32> to vector<8x1xf32>
    %66 = arith.subf %64, %65 : vector<8x1xf32>
    %67 = arith.mulf %66, %66 : vector<8x1xf32>
    %68 = arith.addf %40, %67 : vector<8x1xf32>
    %c0_21 = arith.constant 0 : index
    %c32 = arith.constant 32 : index
    %69 = vector.load %arg2[%c0_21, %c32] : memref<8x64xbf16, #tpu.memory_space<vmem>>, vector<8x32xbf16>
    %70 = arith.extf %69 : vector<8x32xbf16> to vector<8x32xf32>
    %c0_22 = arith.constant 0 : index
    %c32_23 = arith.constant 32 : index
    %71 = vector.load %arg3[%c0_22, %c32_23] : memref<8x64xbf16, #tpu.memory_space<vmem>>, vector<8x32xbf16>
    %72 = arith.extf %71 : vector<8x32xbf16> to vector<8x32xf32>
    %73 = arith.mulf %70, %72 : vector<8x32xf32>
    %cst_24 = arith.constant dense<0.000000e+00> : vector<8xf32>
    %74 = vector.multi_reduction <add>, %73, %cst_24 [1] : vector<8x32xf32> to vector<8xf32>
    %75 = vector.shape_cast %74 : vector<8xf32> to vector<8x1xf32>
    %76 = arith.mulf %70, %70 : vector<8x32xf32>
    %cst_25 = arith.constant dense<0.000000e+00> : vector<8xf32>
    %77 = vector.multi_reduction <add>, %76, %cst_25 [1] : vector<8x32xf32> to vector<8xf32>
    %78 = vector.shape_cast %77 : vector<8xf32> to vector<8x1xf32>
    %79 = arith.mulf %72, %72 : vector<8x32xf32>
    %cst_26 = arith.constant dense<0.000000e+00> : vector<8xf32>
    %80 = vector.multi_reduction <add>, %79, %cst_26 [1] : vector<8x32xf32> to vector<8xf32>
    %81 = vector.shape_cast %80 : vector<8xf32> to vector<8x1xf32>
    %82 = math.sqrt %78 : vector<8x1xf32>
    %cst_27 = arith.constant 9.99999993E-9 : f32
    %83 = vector.broadcast %cst_27 : f32 to vector<8x1xf32>
    %84 = arith.maximumf %82, %83 : vector<8x1xf32>
    %85 = math.sqrt %81 : vector<8x1xf32>
    %cst_28 = arith.constant 9.99999993E-9 : f32
    %86 = vector.broadcast %cst_28 : f32 to vector<8x1xf32>
    %87 = arith.maximumf %85, %86 : vector<8x1xf32>
    %88 = arith.mulf %84, %87 : vector<8x1xf32>
    %89 = arith.divf %75, %88 : vector<8x1xf32>
    %c2 = arith.constant 2 : index
    %90 = memref.load %arg5[%c2] : memref<3xf32, #tpu.memory_space<smem>>
    %91 = vector.broadcast %90 : f32 to vector<8x1xf32>
    %92 = arith.mulf %91, %89 : vector<8x1xf32>
    %93 = vector.extract_strided_slice %11 {offsets = [0, 2], sizes = [8, 1], strides = [1, 1]} : vector<8x3xf32> to vector<8x1xf32>
    %94 = arith.subf %92, %93 : vector<8x1xf32>
    %95 = arith.mulf %94, %94 : vector<8x1xf32>
    %96 = arith.addf %68, %95 : vector<8x1xf32>
    %cst_29 = arith.constant 0.000000e+00 : f32
    %97 = vector.broadcast %cst_29 : f32 to vector<8x1xf32>
    %98 = arith.select %10, %96, %97 : vector<8x1xi1>, vector<8x1xf32>
    %99 = vector.shape_cast %98 : vector<8x1xf32> to vector<1x8x1xf32>
    %cst_30 = arith.constant dense<0.000000e+00> : vector<1xf32>
    %100 = vector.multi_reduction <add>, %99, %cst_30 [1, 2] : vector<1x8x1xf32> to vector<1xf32>
    %101 = vector.shape_cast %100 : vector<1xf32> to vector<1x1x1xf32>
    %102 = vector.extract %101[0, 0, 0] : f32 from vector<1x1x1xf32>
    %103 = tpu.iota {dimensions = array<i32: 0>} : vector<8x128xi32>
    %104 = tpu.iota {dimensions = array<i32: 1>} : vector<8x128xi32>
    %c0_31 = arith.constant 0 : index
    %c0_32 = arith.constant 0 : index
    %105 = vector.load %arg6[%c0_31, %c0_32] : memref<8x128xf32, #tpu.memory_space<vmem>>, vector<8x128xf32>
    %c0_i32_33 = arith.constant 0 : i32
    %106 = vector.broadcast %c0_i32_33 : i32 to vector<8x128xi32>
    %107 = arith.cmpi eq, %103, %106 : vector<8x128xi32>
    %c0_i32_34 = arith.constant 0 : i32
    %108 = vector.broadcast %c0_i32_34 : i32 to vector<8x128xi32>
    %109 = arith.cmpi eq, %104, %108 : vector<8x128xi32>
    %110 = arith.andi %107, %109 : vector<8x128xi1>
    %cst_35 = arith.constant 0.000000e+00 : f32
    %111 = vector.broadcast %102 : f32 to vector<8x128xf32>
    %112 = vector.broadcast %cst_35 : f32 to vector<8x128xf32>
    %113 = arith.select %110, %111, %112 : vector<8x128xi1>, vector<8x128xf32>
    %114 = arith.addf %105, %113 : vector<8x128xf32>
    %c0_36 = arith.constant 0 : index
    %c0_37 = arith.constant 0 : index
    %115 = vector.load %arg6[%c0_36, %c0_37] : memref<8x128xf32, #tpu.memory_space<vmem>>, vector<8x128xf32>
    tpu.vector_store %arg6[%c0_36, %c0_37], %114 {strides = array<i32>} : memref<8x128xf32, #tpu.memory_space<vmem>>, vector<8x128xf32>,
    return
  }
  func.func @transform_0(%arg0: i32, %arg1: i32) -> (i32, i32) {
    %c1_i32 = arith.constant 1 : i32
    %0 = arith.muli %arg0, %c1_i32 : i32
    %1 = arith.addi %0, %arg1 : i32
    %c0_i32 = arith.constant 0 : i32
    %2 = arith.minsi %1, %c0_i32 : i32
    %c0_i32_0 = arith.constant 0 : i32
    %c0_i32_1 = arith.constant 0 : i32
    return %2, %c0_i32_0 : i32, i32
  }
  func.func @transform_1(%arg0: i32, %arg1: i32) -> (i32, i32) {
    %c1_i32 = arith.constant 1 : i32
    %0 = arith.muli %arg0, %c1_i32 : i32
    %1 = arith.addi %0, %arg1 : i32
    %c0_i32 = arith.constant 0 : i32
    %2 = arith.minsi %1, %c0_i32 : i32
    %c0_i32_0 = arith.constant 0 : i32
    %c0_i32_1 = arith.constant 0 : i32
    return %2, %c0_i32_0 : i32, i32
  }
  func.func @transform_2(%arg0: i32, %arg1: i32) -> (i32, i32) {
    %c1_i32 = arith.constant 1 : i32
    %0 = arith.muli %arg0, %c1_i32 : i32
    %1 = arith.addi %0, %arg1 : i32
    %c0_i32 = arith.constant 0 : i32
    %2 = arith.minsi %1, %c0_i32 : i32
    %c0_i32_0 = arith.constant 0 : i32
    %c0_i32_1 = arith.constant 0 : i32
    return %2, %c0_i32_0 : i32, i32
  }
  func.func @transform_3(%arg0: i32, %arg1: i32) -> i32 {
    %c0_i32 = arith.constant 0 : i32
    %c0_i32_0 = arith.constant 0 : i32
    return %c0_i32 : i32
  }
  func.func @transform_4(%arg0: i32, %arg1: i32) -> (i32, i32) {
    %c0_i32 = arith.constant 0 : i32
    %c0_i32_0 = arith.constant 0 : i32
    return %arg0, %c0_i32 : i32, i32
  }
}

</mosaic_0001>

<bundles_post_ra>
// kernel: tpu_custom_call.1
= control target key start
LH: loop header
LB: loop body
LE: loop exit
PB: predicated region body
PF: predicated region fallthrough
CT: control target
= control target key end

     0   :  { %9 = vsyncpa [#allocation4], 0  ;;  %s1006_s0 = inlined_call_operand.vmem [shape: bf16[8,64], index: 0, kind: input, shape index: {}]   ;;  %s1007_s1 = inlined_call_operand.vmem [shape: bf16[8,64], index: 1, kind: input, shape index: {}]   ;;  %s1008_s2 = inlined_call_operand.vmem [shape: f32[8,3], index: 2, kind: input, shape index: {}]   ;;  %s1009_s3 = inlined_call_operand.vmem [shape: f32[3], index: 3, kind: input, shape index: {}]   ;;  %s1010_s4 = inlined_call_operand.hbm [shape: f32[16,128], index: 4, kind: output, shape index: {}]  }
   0x1   :  { %10 = vsyncpa [#allocation3], 0 }
   0x2   :  { %12 = vsyncpa [#allocation3 + $0x1], 0  ;;  %s856_s15 = smov 0   ;;  %s858_s16 = smov 0  }
   0x3   :  { %s860_s17 = smov 0   ;;  %s862_s18 = smov 0  }
   0x4   :  { %s864_s19 = smov 0   ;;  %s866_s20 = smov 0  }
   0x5 LB: > { %s608_s21 = sadd.s32 4294967295, %s823_s20   ;;  %s609_s22 = sadd.s32 4294967294, %s823_s20   ;;  %s823_s20 = sphi %s866_s20, %s18_s20   ;;  %s819_s19 = sphi %s864_s19, %s1019_s19   ;;  %s815_s18 = sphi %s862_s18, %s1018_s18   ;;  %s811_s17 = sphi %s860_s17, %s1017_s17   ;;  %s807_s16 = sphi %s858_s16, %s1016_s16   ;;  %s803_s15 = sphi %s856_s15, %s1015_s15  }
   0x6   : > { %s30_s23 = sadd.s32 1, %s819_s19  ;;  %s154_s24 = sadd.s32 1, %s811_s17 }
   0x7   : > { %p32_p0 = scmp.ge.s32.totalorder %s30_s23, 2  ;;  %p164_p1 = scmp.ne.s32.totalorder %s811_s17, %s807_s16 }
   0x8   : > { %p165_p2 = scmp.eq.s32.totalorder %s608_s21, 1  ;;  %p170_p3 = scmp.ne.s32.totalorder %s807_s16, %s803_s15 }
   0x9   : > { %s1021_s23 = smov (%p32_p0, %s30_s23), 0  ;;  %p171_p5 = scmp.eq.s32.totalorder %s609_s22, 1 }
   0xa   : > { %p896_p4 = por %p165_p2, %p164_p1  ;;  %s151_s26 = ssub.s32 %s819_s19, %s1021_s23 }
   0xb   : > { %p610_p6 = scmp.ge.s32.totalorder %s823_s20, 1  ;;  %p152_p7 = scmp.eq.s32.totalorder %s151_s26, 0 }
   0xc   : > { %p903_p8 = por %p171_p5, %p170_p3  ;;  %p178_p9 = scmp.lt.s32.totalorder %s823_s20, 3 }
   0xd   : > { %s909_s28 = scalar_select %p152_p7, %s811_s17, %s154_s24  }
   0xe   : > { %p911_p10 = pnand %p610_p6, %p178_p9  ;;  %p915_p11 = scmp.eq.s32.totalorder %s608_s21, 0 }
   0xf   : > { %s191_s7 = sshll.u32 %s1009_s3, 4  ;;  %s192_s7 = int_to_ptr.vmem [resolvable:$true] %s191_s7 }
  0x10   : > { %p643_p12 = pneg %p911_p10  ;;  %s726_s8 = scalar_lea.vmem %s192_s7, 16 }
  0x11   : > { %p727_p0 = scmp.ne.s32.totalorder %s192_s7, %s726_s8  ;;  %p734_p5 = scmp.lt.s32.totalorder %s192_s7, %s192_s7 }
  0x12   : > { %p644_p13 = pnand %p915_p11, %p643_p12  ;;  %p735_p6 = scmp.lt.s32.totalorder %s726_s8, %s726_s8 }
  0x14   : > { %p728_p1 = pneg %p644_p13  ;;  %p736_p7 = por %p735_p6, %p734_p5 }
  0x16   : > { %p729_p2 = pnand %p728_p1, %p727_p0 }
  0x18   : > { %p730_p3 = pneg %p729_p2 }
  0x1a   : > { %p737_p9 = pnand %p736_p7, %p730_p3 }
  0x1c   : > { %740 = shalt.err (!%p737_p9)
}
  0x1d   : > { %s825_s9 = smov [#allocation2]   ;;  %243 = sbr.rel (%p911_p10) target bundleno = 694 (0x2b6), region = 36 }
  0x1e   : > { %646 = dma.vmem_to_smem (!%p644_p13), %s192_s7, 16, %s825_s9, [#allocation4]  }
  0x24   : > { %794 = dma.done.wait (%p915_p11), [#allocation4], 16  }
  0x25   : > { %796 = vsyncadd (%p915_p11), [#allocation4], 4294967280 }
  0x26   : > { %249 = sfence }
  0x27   : > { %p287_p12 = scmp.lt.s32.totalorder %s815_s18, 0  ;;  %s826_s26 = smov 112   ;;  %vm334_vm0 = vcmask 130048   ;;  %vm424_vm1 = vcmask 261120   ;;  %vm470_vm15 = vcmask 7168  }
  0x28   : > { %s827_s29 = smov 96   ;;  %s629_s30 = sld [smem:[#allocation2 + $0x1]] }
  0x29   : > { %s288_s10 = scalar_select %p287_p12, %s815_s18, 0 }
  0x2a   : > { %s630_s5 = sld [smem:[#allocation2 + $0x2]]  ;;  %s365_s12 = sld [smem:[#allocation2]] }
  0x2b   : > { %s1023_s10 = smov (!%p287_p12, %s288_s10), 0  ;;  %s628_s13 = sshll.u32 %s815_s18, 3 }
  0x2c   : > { %s619_s11 = sshll.u32 %s1023_s10, 2  ;;  %s627_s6 = sshll.u32 %s1023_s10, 3 }
  0x2d   : > { %s292_s14 = scalar_lea.vmem %s1006_s0, %s619_s11  ;;  %s302_s24 = scalar_lea.vmem %s1007_s1, %s619_s11 }
  0x2e   : > { %v329_v0 = vld [vmem:[%s292_s14] sm:$0xf]  ;;  %s312_s9 = scalar_lea.vmem %s1008_s2, %s627_s6  ;;  %v412_v54 = vstv %s629_s30  ;;  %s828_s11 = smov 127  }
  0x2f   : > { %v331_v1 = vld [vmem:[%s302_s24] sm:$0xf]  ;;  %v330_v2 = vunpack.c.l.bf16 %v329_v0  ;;  %s829_s10 = smov 126   ;;  %s283_s14 = sand.u32 1, %s807_s16  }
  0x30   : > { %v332_v3 = vunpack.c.l.bf16 %v331_v1  ;;  %v328_v57 = vld [vmem:[%s312_s9] sm:$0xff]  ;;  %v460_v60 = vstv %s630_s5  ;;  %s615_s21 = sshll.u32 %s283_s14, 3  ;;  %s632_s22 = sshll.u32 %s815_s18, 7 }
  0x31   : > { %v338_v4 = vmul.f32 %v330_v2, %v330_v2  ;;  %s959_s6 = scalar_lea.hbm %s1010_s4, %s632_s22  ;;  %s492_s7 = scalar_lea.sflag [#allocation3], %s283_s14 }
  0x32   : > { %v342_v5 = vmul.f32 %v332_v3, %v332_v3  ;;  %v333_v6 = vmul.f32 %v332_v3, %v330_v2  ;;  %s830_s18 = smov [#allocation5]  }
  0x33   : > { %379 = vrot.lane.b32.xlu0 %v338_v4, %s826_s26  ;;  %428 = vrot.lane.b32.xlu1 %v338_v4, %s827_s29  ;;  %v339_v19 = vsel %vm334_vm0, %v338_v4, 0.0  ;;  %s745_s9 = sshll.u32 %s830_s18, 4  ;;  %s746_s9 = int_to_ptr.vmem [resolvable:$false] %s745_s9 }
  0x34   : > { %v343_v20 = vsel %vm334_vm0, %v342_v5, 0.0  ;;  %v335_v21 = vsel %vm334_vm0, %v333_v6, 0.0 }
  0x37   : > { %386 = vrot.lane.b32.xlu0 %v342_v5, %s826_s26  ;;  %434 = vrot.lane.b32.xlu1 %v342_v5, %s827_s29 }
  0x3b   : > { %372 = vrot.lane.b32.xlu0 %v333_v6, %s826_s26  ;;  %421 = vrot.lane.b32.xlu1 %v333_v6, %s827_s29  ;;  %s285_s26 = scalar_lea.vmem [#allocation5], %s615_s21 }
  0x3c   : > { %s505_s29 = sshll.u32 %s285_s26, 4  ;;  %s961_s29 = int_to_ptr.vmem [resolvable:$true] %s505_s29 }
  0x3d   : > { %s741_s8 = scalar_lea.vmem %s961_s29, 128  ;;  %p748_p0 = scmp.lt.s32.totalorder %s961_s29, %s746_s9 }
  0x3e   : > { %p742_p10 = scmp.ne.s32.totalorder %s961_s29, %s741_s8 }
  0x40   : > { %p743_p11 = pnand %p742_p10, %p896_p4 }
  0x42   : > { %p744_p13 = pneg %p743_p11 }
  0xa5   : > { %v380_v7 = vpop.permute.xlu0 %379  ;;  %v429_v8 = vpop.permute.xlu1 %428 }
  0xa6   : > { %v382_v9 = vsel %vm334_vm0, %v380_v7, 0.0  ;;  %v431_v10 = vsel %vm424_vm1, %v429_v8, 0.0 }
  0xa7   : > { %383 = vadd.xlane.f32.xlu0 %v382_v9 }
  0xa9   : > { %v387_v11 = vpop.permute.xlu0 %386  ;;  %v435_v12 = vpop.permute.xlu1 %434 }
  0xaa   : > { %v389_v13 = vsel %vm334_vm0, %v387_v11, 0.0  ;;  %v437_v14 = vsel %vm424_vm1, %v435_v12, 0.0 }
  0xab   : > { %390 = vadd.xlane.f32.xlu1 %v389_v13  ;;  %432 = vadd.xlane.f32.xlu0 %v431_v10 }
  0xad   : > { %v373_v15 = vpop.permute.xlu0 %372  ;;  %v422_v16 = vpop.permute.xlu1 %421 }
  0xae   : > { %v375_v17 = vsel %vm334_vm0, %v373_v15, 0.0  ;;  %v425_v18 = vsel %vm424_vm1, %v422_v16, 0.0 }
  0xaf   : > { %438 = vadd.xlane.f32.xlu0 %v437_v14  ;;  %376 = vadd.xlane.f32.xlu1 %v375_v17 }
  0xb3   : > { %426 = vadd.xlane.f32.xlu0 %v425_v18  ;;  %340 = vadd.xlane.f32.xlu1 %v339_v19 }
  0xb7   : > { %344 = vadd.xlane.f32.xlu0 %v343_v20  ;;  %336 = vadd.xlane.f32.xlu1 %v335_v21  ;;  %v366_v21 = vstv %s365_s12 }
 0x134   : > { %v384_v22 = vpop.xlane.xlu0 %383 }
 0x135   : > { %708 = vrsqrt.f32 %v384_v22  ;;  %vm394_vm2 = vcmp.eq.f32.partialorder %v384_v22, inf  ;;  %v397_v30 = vand.u32 2147483648, %v384_v22  ;;  %vm396_vm3 = vcmp.eq.f32.partialorder %v384_v22, 0.0 }
 0x138   : > { %v391_v23 = vpop.xlane.xlu1 %390  ;;  %v433_v24 = vpop.xlane.xlu0 %432 }
 0x139   : > { %710 = vrsqrt.f32 %v391_v23  ;;  %vm402_vm4 = vcmp.eq.f32.partialorder %v391_v23, inf  ;;  %v405_v34 = vand.u32 2147483648, %v391_v23  ;;  %vm404_vm5 = vcmp.eq.f32.partialorder %v391_v23, 0.0 }
 0x13a   : > { %712 = vrsqrt.f32 %v433_v24  ;;  %vm442_vm6 = vcmp.eq.f32.partialorder %v433_v24, inf  ;;  %v445_v40 = vand.u32 2147483648, %v433_v24  ;;  %vm444_vm7 = vcmp.eq.f32.partialorder %v433_v24, 0.0 }
 0x13c   : > { %v439_v25 = vpop.xlane.xlu0 %438  ;;  %v377_v52 = vpop.xlane.xlu1 %376 }
 0x13d   : > { %714 = vrsqrt.f32 %v439_v25  ;;  %vm450_vm8 = vcmp.eq.f32.partialorder %v439_v25, inf  ;;  %v453_v45 = vand.u32 2147483648, %v439_v25  ;;  %vm452_vm9 = vcmp.eq.f32.partialorder %v439_v25, 0.0 }
 0x13f   : > { %v709_v26 = vpop.eup %708 }
 0x140   : > { %v393_v27 = vmul.f32 %v709_v26, %v384_v22  ;;  %v427_v56 = vpop.xlane.xlu0 %426  ;;  %v341_v3 = vpop.xlane.xlu1 %340  ;;  %v325_v26 = vstv %s628_s13 }
 0x141   : > { %vm348_vm10 = vcmp.eq.f32.partialorder %v341_v3, inf  ;;  %v351_v9 = vand.u32 2147483648, %v341_v3  ;;  %vm350_vm12 = vcmp.eq.f32.partialorder %v341_v3, 0.0 }
 0x142   : > { %v395_v28 = vsel %vm394_vm2, %v384_v22, %v393_v27  ;;  %v323_v22 = vlaneseq }
 0x143   : > { %v711_v29 = vpop.eup %710  ;;  %v398_v33 = vsel %vm396_vm3, %v397_v30, %v395_v28 }
 0x144   : > { %v713_v31 = vpop.eup %712  ;;  %v401_v32 = vmul.f32 %v711_v29, %v391_v23  ;;  %v399_v43 = vmax.f32 %v398_v33, 1e-08  ;;  %v345_v4 = vpop.xlane.xlu0 %344 }
 0x145   : > { %v441_v35 = vmul.f32 %v713_v31, %v433_v24  ;;  %vm356_vm11 = vcmp.eq.f32.partialorder %v345_v4, inf  ;;  %v359_v10 = vand.u32 2147483648, %v345_v4  ;;  %vm358_vm13 = vcmp.eq.f32.partialorder %v345_v4, 0.0  ;;  %v337_v19 = vpop.xlane.xlu1 %336 }
 0x146   : > { %v403_v36 = vsel %vm402_vm4, %v391_v23, %v401_v32 }
 0x147   : > { %v715_v37 = vpop.eup %714  ;;  %v406_v38 = vsel %vm404_vm5, %v405_v34, %v403_v36  ;;  %v443_v39 = vsel %vm442_vm6, %v433_v24, %v441_v35  ;;  %v324_v24 = vshrl.u32 %v323_v22, 7 }
 0x148   : > { %v449_v41 = vmul.f32 %v715_v37, %v439_v25  ;;  %v407_v42 = vmax.f32 %v406_v38, 1e-08  ;;  %v446_v44 = vsel %vm444_vm7, %v445_v40, %v443_v39 }
 0x149   : > { %v447_v49 = vmax.f32 %v446_v44, 1e-08  ;;  %v326_v28 = vadd.s32 %v325_v26, %v324_v24  ;;  %vm484_vm0 = vcmp.eq.s32.totalorder %v324_v24, 0 }
 0x14a   : > { %v451_v46 = vsel %vm450_vm8, %v439_v25, %v449_v41  ;;  %v408_v47 = vmul.f32 %v407_v42, %v399_v43  ;;  %v482_v42 = vand.u32 127, %v323_v22 }
 0x14b   : > { %v454_v48 = vsel %vm452_vm9, %v453_v45, %v451_v46  ;;  %vm327_vm14 = vcmp.lt.s32.totalorder %v326_v28, 8 }
 0x14c   : > { %716 = vrcp.f32 %v408_v47  ;;  %v455_v50 = vmax.f32 %v454_v48, 1e-08  ;;  %vm485_vm1 = vcmp.eq.s32.totalorder %v482_v42, 0 }
 0x14d   : > { %vm486_vm2 = vmand %vm484_vm0, %vm485_vm1 }
 0x14e   : > { %v456_v51 = vmul.f32 %v455_v50, %v447_v49 }
 0x150   : > { %718 = vrcp.f32 %v456_v51 }
 0x151   : > { %720 = vrsqrt.f32 %v341_v3 }
 0x152   : > { %722 = vrsqrt.f32 %v345_v4 }
 0x156   : > { %v717_v53 = vpop.eup %716 }
 0x157   : > { %v410_v55 = vmul.f32 %v717_v53, %v377_v52 }
 0x159   : > { %v413_v58 = vmul.f32 %v412_v54, %v410_v55 }
 0x15a   : > { %v719_v59 = vpop.eup %718 }
 0x15b   : > { %v458_v61 = vmul.f32 %v719_v59, %v427_v56  ;;  %v414_v62 = vsub.f32 %v413_v58, %v328_v57  ;;  %v721_v5 = vpop.eup %720 }
 0x15c   : > { %v723_v6 = vpop.eup %722  ;;  %v347_v7 = vmul.f32 %v721_v5, %v341_v3 }
 0x15d   : > { %v461_v63 = vmul.f32 %v460_v60, %v458_v61  ;;  %v415_v0 = vmul.f32 %v414_v62, %v414_v62  ;;  %v355_v8 = vmul.f32 %v723_v6, %v345_v4 }
 0x15e   : > { %v349_v11 = vsel %vm348_vm10, %v341_v3, %v347_v7 }
 0x15f   : > { %417 = vrot.lane.b32.xlu0 %v415_v0, %s828_s11  ;;  %v462_v1 = vsub.f32 %v461_v63, %v328_v57  ;;  %v357_v12 = vsel %vm356_vm11, %v345_v4, %v355_v8  ;;  %v352_v13 = vsel %vm350_vm12, %v351_v9, %v349_v11  ;;  %s747_s11 = scalar_lea.vmem %s746_s9, 256 }
 0x160   : > { %v360_v14 = vsel %vm358_vm13, %v359_v10, %v357_v12  ;;  %v353_v15 = vmax.f32 %v352_v13, 1e-08  ;;  %p749_p1 = scmp.lt.s32.totalorder %s747_s11, %s741_s8 }
 0x161   : > { %v463_v2 = vmul.f32 %v462_v1, %v462_v1  ;;  %v361_v16 = vmax.f32 %v360_v14, 1e-08 }
 0x162   : > { %p750_p2 = por %p749_p1, %p748_p0 }
 0x163   : > { %465 = vrot.lane.b32.xlu1 %v463_v2, %s829_s10  ;;  %v362_v17 = vmul.f32 %v361_v16, %v353_v15 }
 0x164   : > { %p751_p3 = pnand %p750_p2, %p744_p13 }
 0x165   : > { %724 = vrcp.f32 %v362_v17 }
 0x16f   : > { %v725_v18 = vpop.eup %724 }
 0x170   : > { %v364_v20 = vmul.f32 %v725_v18, %v337_v19 }
 0x172   : > { %v367_v23 = vmul.f32 %v366_v21, %v364_v20 }
 0x174   : > { %v368_v25 = vsub.f32 %v367_v23, %v328_v57 }
 0x176   : > { %v369_v29 = vmul.f32 %v368_v25, %v368_v25 }
 0x1d1   : > { %v418_v27 = vpop.permute.xlu0 %417 }
 0x1d2   : > { %v420_v30 = vadd.f32 %v418_v27, %v369_v29 }
 0x1d5   : > { %v466_v31 = vpop.permute.xlu1 %465 }
 0x1d6   : > { %v468_v32 = vadd.f32 %v466_v31, %v420_v30 }
 0x1d8   : > { %v469_v33 = vsel %vm327_vm14, %v468_v32, 0.0 }
 0x1d9   : > { %v471_v34 = vsel %vm470_vm15, %v469_v33, 0.0 }
 0x1da   : > { %472 = vadd.xlane.f32.xlu1 %v471_v34 }
 0x267   : > { %v473_v35 = vpop.xlane.xlu1 %472 }
 0x268   : > { %v474_v36 = vrot.slane %v473_v35, 4 }
 0x26a   : > { %v475_v37 = vadd.f32 %v474_v36, %v473_v35 }
 0x26c   : > { %v476_v38 = vrot.slane %v475_v37, 2 }
 0x26e   : > { %v477_v39 = vadd.f32 %v476_v38, %v475_v37 }
 0x270   : > { %v478_v40 = vrot.slane %v477_v39, 1 }
 0x272   : > { %v479_v41 = vadd.f32 %v478_v40, %v477_v39 }
 0x274   : > { %635 = vpush %v479_v41 }
 0x2a5   : > { %s636_s24 = spop %635 }
 0x2a6   : > { %v487_v43 = vstv %s636_s24 }
 0x2a7   : > { %v488_v44 = vsel %vm486_vm2, %v487_v43, 0.0 }
 0x2a8   : > { %490 = vst [vmem:[%s285_s26] sm:$0xff] %v488_v44 }
 0x2a9   : > { %754 = shalt.err (!%p751_p3)
}
 0x2aa   : > { %s755_s10 = scalar_lea.hbm %s959_s6, 128  ;;  %s759_s14 = scalar_lea.hbm %s1010_s4, 256 }
 0x2ab   : > { %p756_p5 = scmp.ne.s32.totalorder %s959_s6, %s755_s10  ;;  %p760_p9 = scmp.lt.u32.totalorder %s959_s6, %s1010_s4 }
 0x2ac   : > { %p761_p12 = scmp.lt.u32.totalorder %s759_s14, %s755_s10  ;;  %p763_p11 = scmp.lt.u32.totalorder %s755_s10, %s959_s6 }
 0x2ad   : > { %p757_p6 = pnand %p756_p5, %p896_p4 }
 0x2ae   : > { %p762_p10 = por %p761_p12, %p760_p9 }
 0x2af   : > { %p758_p7 = pneg %p757_p6 }
 0x2b0   : > { %p764_p13 = por %p763_p11, %p762_p10 }
 0x2b2   : > { %p765_p0 = pnand %p764_p13, %p758_p7 }
 0x2b4   : > { %768 = shalt.err (!%p765_p0)
}
 0x2b5   : > { %641 = dma.vmem_to_hbm [thread:$0]  (%p896_p4), %s961_s29, 128, %s959_s6, %s492_s7  }
 0x2b6 PF: > { %p653_p1 = scmp.ge.s32.totalorder %s823_s20, 2  ;;  %s517_s24 = sand.u32 1, %s803_s15  }
 0x2b7   : > { %s518_s26 = scalar_lea.sflag [#allocation3], %s517_s24 }
 0x2b8   : > { %p648_p2 = pnand %p653_p1, %p903_p8 }
 0x2ba   : > { %798 = dma.done.wait (!%p648_p2), %s518_s26, 128  }
 0x2bb   : > { %800 = vsyncadd (!%p648_p2), %s518_s26, 4294967168  ;;  %s18_s20 = sadd.s32 1, %s823_s20   ;;  %s1015_s15 = smov %s807_s16 }
 0x2bc   : > { %p15_p3 = scmp.ge.s32.totalorder %s18_s20, 4   ;;  %s1016_s16 = smov %s811_s17 }
 0x2bd   : > { %s1017_s17 = smov %s909_s28  ;;  %s1018_s18 = smov %s819_s19 }
 0x2be   : > { %s1019_s19 = smov %s1021_s23  ;;  %17 = sbr.rel (!%p15_p3) target bundleno = 5 (0x5), region = 86 }
 0x2c5   :  { %523 = vsyncpa [#allocation3], 1 }
 0x2c6   :  { %525 = vsyncpa [#allocation3 + $0x1], 1 }
 0x2c7   :  { %526 = vsyncpa [#allocation4], 1 }
 0x2c8   :  { %528 = vsyncpa [#allocation4 + $0x1], 1 }

</bundles_post_ra>
